<compile_context>
chip_gen: v6e
topology: v6e:2x2x1
jax: 0.10.0
libtpu: 0.0.40
codegen_flags: <defaults>
</compile_context>

<pallas_src>
import jax
import jax.numpy as jnp
from jax.experimental import pallas as pl
from jax.experimental.pallas import tpu as pltpu


def mlp_kernel(xt_ref, w1_ref, b1_ref, w2_ref, b2_ref, w3_ref, b3_ref, o_ref):
    # xt: (F, tile_b) bf16   w1: (H1, F) bf16   b1: (H1, 1) f32
    # w2: (H2, H1) bf16      b2: (H2, 1) f32
    # w3: (H2, 1)  f32       b3: (1, 1)  f32    o: (1, tile_b) f32
    h1 = jnp.dot(w1_ref[...], xt_ref[...],
                 preferred_element_type=jnp.float32) + b1_ref[...]
    h1 = jnp.maximum(h1, 0.0)                                    # (H1, tile_b) f32
    h2 = jnp.dot(w2_ref[...], h1.astype(jnp.bfloat16),
                 preferred_element_type=jnp.float32) + b2_ref[...]
    h2 = jnp.maximum(h2, 0.0)                                    # (H2, tile_b) f32
    # fc3 (OUT == 1): an N=1 MXU matmul is pure fill/drain latency, so do it on
    # the VPU/XLU instead: broadcast-multiply + sublane reduce -> already
    # lane-dense (1, tile_b).
    y = jnp.sum(h2 * w3_ref[...], axis=0, keepdims=True) + b3_ref[...]
    o_ref[...] = y.astype(o_ref.dtype)


def mlp_forward(x, params, *, tile_b=None):
    """x: [B, F] float32.  params: w1[F,H1], b1[1,H1], w2[H1,H2], b2[1,H2],
    w3[H2,1], b3[1,1] (weights stored [in,out], i.e. transposed from PyTorch).
    Returns [B, 1] float32."""
    B, F = x.shape
    H1 = params["w1"].shape[1]
    H2 = params["w2"].shape[1]
    OUT = params["w3"].shape[1]

    if tile_b is None:
        # Lane-dense batch tile: >=128 keeps every store an unmasked full-vreg
        # write and amortizes the ~0.35us/step grid overhead; at large batch
        # use 512 so the "parallel" grid has several steps (v7x megacore gets
        # work on both TensorCores).  For the toy B=8 case the kernel is pure
        # launch/DMA overhead either way.
        tile_b = 512 if B >= 1024 else 128
    assert tile_b % 128 == 0

    n_tiles = pl.cdiv(B, tile_b)
    Bp = n_tiles * tile_b

    # Host-side layout plumbing: pad ragged batch, put batch on the lane axis,
    # feed the MXU bf16 inputs (f32 accumulation stays inside the kernel).
    xp = x if Bp == B else jnp.pad(x, ((0, Bp - B), (0, 0)))
    xt = xp.T.astype(jnp.bfloat16)                 # (F, Bp)
    w1k = params["w1"].T.astype(jnp.bfloat16)      # (H1, F)
    b1k = params["b1"].T.astype(jnp.float32)       # (H1, 1)
    w2k = params["w2"].T.astype(jnp.bfloat16)      # (H2, H1)
    b2k = params["b2"].T.astype(jnp.float32)       # (H2, 1)
    w3k = params["w3"].astype(jnp.float32)         # (H2, 1)  f32: VPU path
    b3k = params["b3"].astype(jnp.float32)         # (1, 1)

    # Weights/biases are tiny and have a constant block index, so they stay
    # resident in VMEM across all grid steps.  (pipeline_mode=pl.Buffered(1)
    # would drop their second buffer, but at <100 KiB total VMEM never binds,
    # even against v7x's 64 MiB, so it is omitted for portability.)
    def full(a):
        return pl.BlockSpec(a.shape, lambda i: (0,) * a.ndim)

    flops = 2 * Bp * (F * H1 + H1 * H2 + H2 * OUT)
    bytes_accessed = int(
        xt.size * xt.dtype.itemsize
        + sum(int(a.size) * a.dtype.itemsize
              for a in (w1k, b1k, w2k, b2k, w3k, b3k))
        + Bp * OUT * 4)

    out = pl.pallas_call(
        mlp_kernel,
        out_shape=jax.ShapeDtypeStruct((1, Bp), jnp.float32),
        grid_spec=pl.GridSpec(
            grid=(n_tiles,),
            in_specs=[
                pl.BlockSpec((F, tile_b), lambda i: (0, i)),   # x^T tile
                full(w1k), full(b1k),                          # fc1
                full(w2k), full(b2k),                          # fc2
                full(w3k), full(b3k),                          # fc3
            ],
            out_specs=pl.BlockSpec((1, tile_b), lambda i: (0, i)),
        ),
        compiler_params=pltpu.CompilerParams(
            dimension_semantics=("parallel",)),
        cost_estimate=pl.CostEstimate(
            flops=flops, transcendentals=0, bytes_accessed=bytes_accessed),
    )(xt, w1k, b1k, w2k, b2k, w3k, b3k)

    return out.T[:B]                               # (B, OUT=1) float32


def init_params(key, input_size, h1=64, h2=32, out=1):
    # Deterministic synthetic init (uniform, PyTorch-Linear-like bound 1/sqrt(fan_in)).
    ks = jax.random.split(key, 6)

    def lin(kw, kb, fan_in, fan_out):
        bound = 1.0 / jnp.sqrt(fan_in)
        w = jax.random.uniform(kw, (fan_in, fan_out), jnp.float32, -bound, bound)
        b = jax.random.uniform(kb, (1, fan_out), jnp.float32, -bound, bound)
        return w, b

    w1, b1 = lin(ks[0], ks[1], input_size, h1)
    w2, b2 = lin(ks[2], ks[3], h1, h2)
    w3, b3 = lin(ks[4], ks[5], h2, out)
    return dict(w1=w1, b1=b1, w2=w2, b2=b2, w3=w3, b3=b3)


if __name__ == "__main__":
    key = jax.random.PRNGKey(0)
    k_x, k_p = jax.random.split(key)

    batch = 8
    input_size = 16  # stands in for X_train_scaled.shape[1]

    x = jax.random.normal(k_x, (batch, input_size), jnp.float32)
    params = init_params(k_p, input_size)

    out = mlp_forward(x, params)
    out = jax.block_until_ready(out)

    # Reference in plain JAX with the same bf16-input / f32-accumulate math.
    xb = x.astype(jnp.bfloat16)
    h1 = jnp.maximum(
        jnp.dot(xb, params["w1"].astype(jnp.bfloat16),
                preferred_element_type=jnp.float32) + params["b1"], 0.0)
    h2 = jnp.maximum(
        jnp.dot(h1.astype(jnp.bfloat16), params["w2"].astype(jnp.bfloat16),
                preferred_element_type=jnp.float32) + params["b2"], 0.0)
    ref = jnp.dot(h2, params["w3"]) + params["b3"]

    assert out.shape == (batch, 1)
    assert jnp.allclose(out, ref, atol=1e-3, rtol=1e-3)

    print("KERNEL_OK")
</pallas_src>

<mosaic_0001>
module attributes {stable_mosaic.version = 11 : i64} {
  func.func @mlp_kernel(%arg0: i32, %arg1: memref<16x128xbf16, #tpu.memory_space<vmem>>, %arg2: memref<64x16xbf16, #tpu.memory_space<vmem>>, %arg3: memref<64x1xf32, #tpu.memory_space<vmem>>, %arg4: memref<32x64xbf16, #tpu.memory_space<vmem>>, %arg5: memref<32x1xf32, #tpu.memory_space<vmem>>, %arg6: memref<32x1xf32, #tpu.memory_space<vmem>>, %arg7: memref<1x1xf32, #tpu.memory_space<vmem>>, %arg8: memref<1x128xf32, #tpu.memory_space<vmem>>) attributes {dimension_semantics = [#tpu.dimension_semantics<parallel>], iteration_bounds = array<i64: 1>, scalar_prefetch = 0 : i64, scratch_operands = 0 : i64, tpu.core_type = #tpu.core_type<tc>, window_params = [{transform_indices = @transform_0, window_bounds = array<i64: 16, 128>}, {pipeline_mode = #tpu.pipeline_mode<synchronous>, transform_indices = @transform_1, window_bounds = array<i64: 64, 16>}, {pipeline_mode = #tpu.pipeline_mode<synchronous>, transform_indices = @transform_2, window_bounds = array<i64: 64, 1>}, {pipeline_mode = #tpu.pipeline_mode<synchronous>, transform_indices = @transform_3, window_bounds = array<i64: 32, 64>}, {pipeline_mode = #tpu.pipeline_mode<synchronous>, transform_indices = @transform_4, window_bounds = array<i64: 32, 1>}, {pipeline_mode = #tpu.pipeline_mode<synchronous>, transform_indices = @transform_5, window_bounds = array<i64: 32, 1>}, {pipeline_mode = #tpu.pipeline_mode<synchronous>, transform_indices = @transform_6, window_bounds = array<i64: 1, 1>}, {transform_indices = @transform_7, window_bounds = array<i64: 1, 128>}]} {
    %c0 = arith.constant 0 : index
    %c0_0 = arith.constant 0 : index
    %0 = vector.load %arg2[%c0, %c0_0] : memref<64x16xbf16, #tpu.memory_space<vmem>>, vector<64x16xbf16>
    %c0_1 = arith.constant 0 : index
    %c0_2 = arith.constant 0 : index
    %1 = vector.load %arg1[%c0_1, %c0_2] : memref<16x128xbf16, #tpu.memory_space<vmem>>, vector<16x128xbf16>
    %cst = arith.constant dense<0.000000e+00> : vector<64x128xf32>
    %2 = tpu.matmul %0, %1, %cst {dimension_numbers = #tpu.dot_dimension_numbers<[1], [0], [0], [1], [0, 0, 1, 1], [], []>} : vector<64x16xbf16>, vector<16x128xbf16>, vector<64x128xf32> -> vector<64x128xf32>
    %c0_3 = arith.constant 0 : index
    %c0_4 = arith.constant 0 : index
    %3 = vector.load %arg3[%c0_3, %c0_4] : memref<64x1xf32, #tpu.memory_space<vmem>>, vector<64x1xf32>
    %4 = vector.broadcast %3 : vector<64x1xf32> to vector<64x128xf32>
    %5 = arith.addf %2, %4 : vector<64x128xf32>
    %cst_5 = arith.constant 0.000000e+00 : f32
    %6 = vector.broadcast %cst_5 : f32 to vector<64x128xf32>
    %7 = arith.maximumf %5, %6 : vector<64x128xf32>
    %c0_6 = arith.constant 0 : index
    %c0_7 = arith.constant 0 : index
    %8 = vector.load %arg4[%c0_6, %c0_7] : memref<32x64xbf16, #tpu.memory_space<vmem>>, vector<32x64xbf16>
    %9 = arith.truncf %7 : vector<64x128xf32> to vector<64x128xbf16>
    %cst_8 = arith.constant dense<0.000000e+00> : vector<32x128xf32>
    %10 = tpu.matmul %8, %9, %cst_8 {dimension_numbers = #tpu.dot_dimension_numbers<[1], [0], [0], [1], [0, 0, 1, 1], [], []>} : vector<32x64xbf16>, vector<64x128xbf16>, vector<32x128xf32> -> vector<32x128xf32>
    %c0_9 = arith.constant 0 : index
    %c0_10 = arith.constant 0 : index
    %11 = vector.load %arg5[%c0_9, %c0_10] : memref<32x1xf32, #tpu.memory_space<vmem>>, vector<32x1xf32>
    %12 = vector.broadcast %11 : vector<32x1xf32> to vector<32x128xf32>
    %13 = arith.addf %10, %12 : vector<32x128xf32>
    %cst_11 = arith.constant 0.000000e+00 : f32
    %14 = vector.broadcast %cst_11 : f32 to vector<32x128xf32>
    %15 = arith.maximumf %13, %14 : vector<32x128xf32>
    %c0_12 = arith.constant 0 : index
    %c0_13 = arith.constant 0 : index
    %16 = vector.load %arg6[%c0_12, %c0_13] : memref<32x1xf32, #tpu.memory_space<vmem>>, vector<32x1xf32>
    %17 = vector.broadcast %16 : vector<32x1xf32> to vector<32x128xf32>
    %18 = arith.mulf %15, %17 : vector<32x128xf32>
    %cst_14 = arith.constant dense<0.000000e+00> : vector<128xf32>
    %19 = vector.multi_reduction <add>, %18, %cst_14 [0] : vector<32x128xf32> to vector<128xf32>
    %20 = vector.shape_cast %19 : vector<128xf32> to vector<1x128xf32>
    %c0_15 = arith.constant 0 : index
    %c0_16 = arith.constant 0 : index
    %21 = vector.load %arg7[%c0_15, %c0_16] : memref<1x1xf32, #tpu.memory_space<vmem>>, vector<1x1xf32>
    %22 = vector.broadcast %21 : vector<1x1xf32> to vector<1x128xf32>
    %23 = arith.addf %20, %22 : vector<1x128xf32>
    %c0_17 = arith.constant 0 : index
    %c0_18 = arith.constant 0 : index
    %24 = vector.load %arg8[%c0_17, %c0_18] : memref<1x128xf32, #tpu.memory_space<vmem>>, vector<1x128xf32>
    tpu.vector_store %arg8[%c0_17, %c0_18], %23 {strides = array<i32>} : memref<1x128xf32, #tpu.memory_space<vmem>>, vector<1x128xf32>,
    return
  }
  func.func @transform_0(%arg0: i32) -> (i32, i32) {
    %c0_i32 = arith.constant 0 : i32
    %c0_i32_0 = arith.constant 0 : i32
    return %c0_i32, %arg0 : i32, i32
  }
  func.func @transform_1(%arg0: i32) -> (i32, i32) {
    %c0_i32 = arith.constant 0 : i32
    %c0_i32_0 = arith.constant 0 : i32
    %c0_i32_1 = arith.constant 0 : i32
    return %c0_i32, %c0_i32_0 : i32, i32
  }
  func.func @transform_2(%arg0: i32) -> (i32, i32) {
    %c0_i32 = arith.constant 0 : i32
    %c0_i32_0 = arith.constant 0 : i32
    %c0_i32_1 = arith.constant 0 : i32
    return %c0_i32, %c0_i32_0 : i32, i32
  }
  func.func @transform_3(%arg0: i32) -> (i32, i32) {
    %c0_i32 = arith.constant 0 : i32
    %c0_i32_0 = arith.constant 0 : i32
    %c0_i32_1 = arith.constant 0 : i32
    return %c0_i32, %c0_i32_0 : i32, i32
  }
  func.func @transform_4(%arg0: i32) -> (i32, i32) {
    %c0_i32 = arith.constant 0 : i32
    %c0_i32_0 = arith.constant 0 : i32
    %c0_i32_1 = arith.constant 0 : i32
    return %c0_i32, %c0_i32_0 : i32, i32
  }
  func.func @transform_5(%arg0: i32) -> (i32, i32) {
    %c0_i32 = arith.constant 0 : i32
    %c0_i32_0 = arith.constant 0 : i32
    %c0_i32_1 = arith.constant 0 : i32
    return %c0_i32, %c0_i32_0 : i32, i32
  }
  func.func @transform_6(%arg0: i32) -> (i32, i32) {
    %c0_i32 = arith.constant 0 : i32
    %c0_i32_0 = arith.constant 0 : i32
    %c0_i32_1 = arith.constant 0 : i32
    return %c0_i32, %c0_i32_0 : i32, i32
  }
  func.func @transform_7(%arg0: i32) -> (i32, i32) {
    %c0_i32 = arith.constant 0 : i32
    %c0_i32_0 = arith.constant 0 : i32
    return %c0_i32, %arg0 : i32, i32
  }
}

</mosaic_0001>

<bundles_post_ra>
// kernel: tpu_custom_call.1
= control target key start
LH: loop header
LB: loop body
LE: loop exit
PB: predicated region body
PF: predicated region fallthrough
CT: control target
= control target key end

     0   :  { %s567_s0 = inlined_call_operand.vmem [shape: bf16[16,128], index: 0, kind: input, shape index: {}]   ;;  %s568_s1 = inlined_call_operand.vmem [shape: bf16[64,16], index: 1, kind: input, shape index: {}]   ;;  %s569_s2 = inlined_call_operand.vmem [shape: f32[64,1], index: 2, kind: input, shape index: {}]   ;;  %s570_s3 = inlined_call_operand.vmem [shape: bf16[32,64], index: 3, kind: input, shape index: {}]   ;;  %s571_s4 = inlined_call_operand.vmem [shape: f32[32,1], index: 4, kind: input, shape index: {}]   ;;  %s572_s5 = inlined_call_operand.vmem [shape: f32[32,1], index: 5, kind: input, shape index: {}]   ;;  %s573_s6 = inlined_call_operand.<no memory space> [shape: f32[1,1], index: 6, kind: input, shape index: {}]   ;;  %s574_s7 = inlined_call_operand.hbm [shape: f32[1,128], index: 7, kind: output, shape index: {}]  }
   0x1   :  { %v12_v0 = vstv %s573_s6 }
   0x2   :  { %13 = vst [vmem:[#allocation2] sm:$0x1] %v12_v0 }
   0x3   :  { %v415_v1 = vld [vmem:[%s567_s0] sm:$0xff]   ;;  %vm114_vm0 = vcmask 130048   ;;  %v417_v3 = vld [vmem:[%s568_s1 + $0x8] sm:$0xff]   ;;  %v444_v4 = vmov 0   ;;  %v418_v5 = vld [vmem:[%s568_s1 + $0x10] sm:$0xff]  }
   0x4   :  { %v416_v2 = vld [vmem:[%s568_s1] sm:$0xff]   ;;  %389 = vmatprep.subr.bf16.mxu0 %v415_v1  ;;  %413 = vset.pattern.permute.xlu0 %v444_v4  ;;  %v46_v6 = vld [vmem:[%s569_s2 + $0x30] sm:$0xff]  ;;  %v47_v8 = vld [vmem:[%s569_s2 + $0x38] sm:$0xff] }
   0x5   :  { %390 = vmatpush3.bf16.msra.mxu0 %v415_v1  ;;  %391 = vmatprep.mubr.msk.bf16.mxu0 %vm114_vm0, %v416_v2  ;;  %v44_v7 = vld [vmem:[%s569_s2 + $0x20] sm:$0xff]  ;;  %v45_v9 = vld [vmem:[%s569_s2 + $0x28] sm:$0xff]  ;;  %v419_v10 = vld [vmem:[%s568_s1 + $0x18] sm:$0xff]  }
   0x6   :  { %414 = vset.pattern.permute.xlu1 %v444_v4  ;;  %80 = vperm.xlu0 %413, %v46_v6   ;;  %v42_v11 = vld [vmem:[%s569_s2 + $0x10] sm:$0xff]  ;;  %v43_v12 = vld [vmem:[%s569_s2 + $0x18] sm:$0xff] }
   0x7   :  { %70 = vperm.xlu1 %414, %v44_v7  }
   0x8   :  { %392 = vmatmul.mubr.msk.bf16.vlgmr.msra.gmra.mxu0 %vm114_vm0, %v417_v3 }
   0x9   :  { %395 = vmatprep.mubr.msk.bf16.mxu0 %vm114_vm0, %v418_v5 }
   0xa   :  { %85 = vperm.xlu0 %413, %v47_v8  }
   0xb   :  { %75 = vperm.xlu1 %414, %v45_v9  }
   0xc   :  { %14 = vsyncpa [#allocation4], 0  ;;  %v40_v13 = vld [vmem:[%s569_s2] sm:$0xff]  ;;  %v41_v14 = vld [vmem:[%s569_s2 + $0x8] sm:$0xff]  ;;  %vm242_vm1 = vcmask 523264  }
   0xd   :  { %v208_v15 = vld [vmem:[%s571_s4] sm:$0xff]  ;;  %v209_v16 = vld [vmem:[%s571_s4 + $0x8] sm:$0xff]  ;;  %v210_v17 = vld [vmem:[%s571_s4 + $0x10] sm:$0xff] }
   0xe   :  { %60 = vperm.xlu0 %413, %v42_v11   ;;  %v211_v18 = vld [vmem:[%s571_s4 + $0x18] sm:$0xff]  ;;  %v302_v19 = vld [vmem:[%s572_s5] sm:$0xff]  ;;  %v303_v20 = vld [vmem:[%s572_s5 + $0x8] sm:$0xff] }
   0xf   :  { %65 = vperm.xlu1 %414, %v43_v12   ;;  %v304_v21 = vld [vmem:[%s572_s5 + $0x10] sm:$0xff]  ;;  %v305_v22 = vld [vmem:[%s572_s5 + $0x18] sm:$0xff]  ;;  %v339_v23 = vld [vmem:[#allocation2] sm:$0x1] }
  0x10   :  { %396 = vmatmul.mubr.msk.bf16.gmra.mxu0 %vm114_vm0, %v419_v10  ;;  %v420_v24 = vld [vmem:[%s570_s3] sm:$0xff]   ;;  %v421_v61 = vld [vmem:[%s570_s3 + $0x8] sm:$0xff]   ;;  %s445_s3 = smov [#allocation3]  }
  0x11   :  { %407 = vmatprep.mubr.msk.bf16.mxu1 %vm242_vm1, %v420_v24  ;;  %v345_v24 = vlaneseq  ;;  %s357_s18 = sshll.u32 %s445_s3, 4  ;;  %s358_s18 = int_to_ptr.vmem [resolvable:$true] %s357_s18 }
  0x12   :  { %50 = vperm.xlu0 %413, %v40_v13   ;;  %s422_s19 = scalar_lea.vmem %s358_s18, 16  ;;  %s426_s20 = scalar_lea.vmem %s358_s18, 32 }
  0x13   :  { %55 = vperm.xlu1 %414, %v41_v14   ;;  %p423_p0 = scmp.ne.s32.totalorder %s358_s18, %s422_s19  ;;  %p427_p1 = scmp.lt.s32.totalorder %s358_s18, %s358_s18 }
  0x14   :  { %p428_p2 = scmp.lt.s32.totalorder %s426_s20, %s422_s19 }
  0x16   :  { %214 = vperm.xlu0 %413, %v208_v15   ;;  %p429_p3 = por %p428_p2, %p427_p1 }
  0x17   :  { %219 = vperm.xlu1 %414, %v209_v16  }
  0x18   :  { %p430_p4 = pnand %p429_p3, %p423_p0 }
  0x1a   :  { %224 = vperm.xlu0 %413, %v210_v17  }
  0x1b   :  { %229 = vperm.xlu1 %414, %v211_v18  }
  0x1e   :  { %308 = vperm.xlu0 %413, %v302_v19  }
  0x1f   :  { %313 = vperm.xlu1 %414, %v303_v20  }
  0x22   :  { %318 = vperm.xlu0 %413, %v304_v21  }
  0x23   :  { %323 = vperm.xlu1 %414, %v305_v22  }
  0x26   :  { %342 = vperm.xlu0 %413, %v339_v23  }
  0x81   :  { %v81_v27 = vpop.permute.xlu0 %80 }
  0x82   :  { %v71_v25 = vpop.permute.xlu1 %70 }
  0x85   :  { %v86_v32 = vpop.permute.xlu0 %85 }
  0x86   :  { %v76_v30 = vpop.permute.xlu1 %75 }
  0x89   :  { %v61_v40 = vpop.permute.xlu0 %60 }
  0x8a   :  { %v66_v36 = vpop.permute.xlu1 %65 }
  0x8d   :  { %v51_v54 = vpop.permute.xlu0 %50 }
  0x8e   :  { %v56_v50 = vpop.permute.xlu1 %55 }
  0x91   :  { %v215_v62 = vpop.permute.xlu0 %214 }
  0x92   :  { %v220_v63 = vpop.permute.xlu1 %219 }
  0x95   :  { %v225_v0 = vpop.permute.xlu0 %224 }
  0x96   :  { %v230_v2 = vpop.permute.xlu1 %229 }
  0x99   :  { %v309_v7 = vpop.permute.xlu0 %308 }
  0x9a   :  { %v314_v12 = vpop.permute.xlu1 %313 }
  0x9d   :  { %v319_v18 = vpop.permute.xlu0 %318 }
  0x9e   :  { %v324_v21 = vpop.permute.xlu1 %323 }
  0xc8   :  { %v393_v26 = vpop.f32.mrf.mxu0 }
  0xc9   :  { %v170_v46 = vadd.f32 %v393_v26, %v61_v40 }
  0xca   :  { %v161_v28 = vpop.f32.mrf.mxu0 }
  0xcb   :  { %v194_v55 = vmax.f32 %v170_v46, 0.0  ;;  %v162_v56 = vadd.f32 %v161_v28, %v51_v54 }
  0xcc   :  { %v394_v29 = vpop.f32.mrf.mxu0 }
  0xcd   :  { %v173_v42 = vadd.f32 %v394_v29, %v66_v36  ;;  %v192_v59 = vmax.f32 %v162_v56, 0.0 }
  0xce   :  { %v164_v31 = vpop.f32.mrf.mxu0 }
  0xcf   :  { %v195_v51 = vmax.f32 %v173_v42, 0.0  ;;  %v165_v52 = vadd.f32 %v164_v31, %v56_v50 }
  0xd0   :  { %v397_v33 = vpop.f32.mrf.mxu0 }
  0xd1   :  { %v186_v35 = vadd.f32 %v397_v33, %v81_v27  ;;  %v205_v57 = vpack.c.bf16 %v195_v51, %v194_v55  ;;  %v193_v58 = vmax.f32 %v165_v52, 0.0  ;;  %v346_v27 = vshrl.u32 %v345_v24, 7 }
  0xd2   :  { %v177_v34 = vpop.f32.mrf.mxu0 }
  0xd3   :  { %v178_v38 = vadd.f32 %v177_v34, %v71_v25  ;;  %v198_v43 = vmax.f32 %v186_v35, 0.0  ;;  %v204_v60 = vpack.c.bf16 %v193_v58, %v192_v59 }
  0xd4   :  { %v398_v37 = vpop.f32.mrf.mxu0 }
  0xd5   :  { %v189_v39 = vadd.f32 %v398_v37, %v86_v32  ;;  %v196_v47 = vmax.f32 %v178_v38, 0.0  ;;  %v343_v32 = vpop.permute.xlu0 %342 }
  0xd6   :  { %v180_v41 = vpop.f32.mrf.mxu0 }
  0xd7   :  { %v199_v44 = vmax.f32 %v189_v39, 0.0  ;;  %v181_v45 = vadd.f32 %v180_v41, %v76_v30  ;;  %v347_v30 = vsub.s32 0, %v346_v27 }
  0xd9   :  { %v197_v48 = vmax.f32 %v181_v45, 0.0  ;;  %v207_v49 = vpack.c.bf16 %v199_v44, %v198_v43  ;;  %v348_v34 = vrot.slane %v343_v32, %v347_v30 }
  0xdb   :  { %v206_v53 = vpack.c.bf16 %v197_v48, %v196_v47  ;;  %399 = vmatprep.subr.bf16.mxu1 %v207_v49 }
  0xdc   :  { %400 = vmatpush3.bf16.msra.mxu1 %v207_v49 }
  0xdd   :  { %401 = vmatprep.subr.bf16.mxu1 %v206_v53 }
  0xe0   :  { %402 = vmatpush3.bf16.msra.mxu1 %v206_v53 }
  0xe1   :  { %403 = vmatprep.subr.bf16.mxu1 %v205_v57 }
  0xe4   :  { %404 = vmatpush3.bf16.msra.mxu1 %v205_v57 }
  0xe5   :  { %405 = vmatprep.subr.bf16.mxu1 %v204_v60 }
  0xe8   :  { %406 = vmatpush3.bf16.msra.mxu1 %v204_v60 }
  0xeb   :  { %408 = vmatmul.mubr.msk.bf16.vlgmr.msra.gmra.mxu1 %vm242_vm1, %v421_v61 }
 0x1ab   :  { %v409_v1 = vpop.f32.mrf.mxu1 }
 0x1ac   :  { %v292_v6 = vadd.f32 %v409_v1, %v225_v0 }
 0x1ad   :  { %v283_v3 = vpop.f32.mrf.mxu1 }
 0x1ae   :  { %v284_v4 = vadd.f32 %v283_v3, %v215_v62  ;;  %v300_v13 = vmax.f32 %v292_v6, 0.0 }
 0x1af   :  { %v410_v5 = vpop.f32.mrf.mxu1 }
 0x1b0   :  { %v298_v9 = vmax.f32 %v284_v4, 0.0  ;;  %v295_v10 = vadd.f32 %v410_v5, %v230_v2  ;;  %v328_v19 = vmul.f32 %v319_v18, %v300_v13 }
 0x1b1   :  { %v286_v8 = vpop.f32.mrf.mxu1 }
 0x1b2   :  { %v287_v11 = vadd.f32 %v286_v8, %v220_v63  ;;  %v326_v15 = vmul.f32 %v309_v7, %v298_v9  ;;  %v301_v16 = vmax.f32 %v295_v10, 0.0 }
 0x1b4   :  { %v299_v14 = vmax.f32 %v287_v11, 0.0  ;;  %v329_v22 = vmul.f32 %v324_v21, %v301_v16 }
 0x1b6   :  { %v327_v17 = vmul.f32 %v314_v12, %v299_v14 }
 0x1b8   :  { %v330_v20 = vadd.f32 %v327_v17, %v326_v15 }
 0x1ba   :  { %v331_v23 = vadd.f32 %v330_v20, %v328_v19 }
 0x1bc   :  { %v332_v25 = vadd.f32 %v331_v23, %v329_v22 }
 0x1be   :  { %v333_v26 = vrot.slane %v332_v25, 4 }
 0x1c0   :  { %v334_v28 = vadd.f32 %v333_v26, %v332_v25 }
 0x1c2   :  { %v335_v29 = vrot.slane %v334_v28, 2 }
 0x1c4   :  { %v336_v31 = vadd.f32 %v335_v29, %v334_v28 }
 0x1c6   :  { %v337_v33 = vrot.slane %v336_v31, 1 }
 0x1c8   :  { %v338_v35 = vadd.f32 %v337_v33, %v336_v31 }
 0x1ca   :  { %v349_v36 = vadd.f32 %v348_v34, %v338_v35 }
 0x1cc   :  { %350 = vst [vmem:[#allocation3] sm:$0x1] %v349_v36 }
 0x1cd   :  { %433 = shalt.err (!%p430_p4)
}
 0x1ce   :  { %360 = dma.vmem_to_hbm [thread:$0]  %s358_s18, 16, %s574_s7, [#allocation4]  }
 0x1cf   :  { %442 = dma.done.wait [#allocation4], 16  }
 0x1d0   :  { %443 = vsyncadd [#allocation4], 4294967280 }
 0x1d1   :  { %364 = vsyncpa [#allocation4], 1 }

</bundles_post_ra>
